<compile_context>
chip_gen: v7x
topology: tpu7x:2x2x1
jax: 0.10.0
libtpu: 0.0.40
codegen_flags: <defaults>
</compile_context>

<pallas_src>
import jax
import jax.numpy as jnp
from jax import lax
from jax.experimental import pallas as pl
from jax.experimental.pallas import tpu as pltpu

INPUT_SIZE = 6
HIDDEN = 32
F_PAD = 8            # pad input feature dim 6 -> 8 (sublane-friendly)
SMALL_BATCH_MAX = 64 # <= 64 -> hidden-in-lanes path, > 64 -> batch-in-lanes path


def _round_up(x, m):
    return ((x + m - 1) // m) * m


# --------------------------------------------------------------------------------------
# Path S: small batch (per-block TB <= 32).  Hidden size (4H = 128) sits in the lanes.
# --------------------------------------------------------------------------------------
def _lstm_head_kernel_small(x_ref, wih_ref, whh_ref, b_ref, fcw_ref, fcb_ref,
                            out_ref, xw_ref):
    """x_ref:   (T, TB, F_PAD)   time-major input tile (TB multiple of 8)
       wih_ref: (F_PAD, 4H)      input->gates weights (gate order i,f,g,o)
       whh_ref: (H, 4H)          hidden->gates weights
       b_ref:   (1, 4H)          b_ih + b_hh
       fcw_ref: (1, H)           final linear weight row
       fcb_ref: (1, 1)           final linear bias
       out_ref: (TB, 1)          sigmoid(fc(h_T))
       xw_ref:  (T*TB, 4H) VMEM  precomputed input projection."""
    T, TB, F = x_ref.shape
    H = whh_ref.shape[0]

    # Hoisted off the recurrence: one matmul for all timesteps, bias folded in.
    # (T, TB, 8) -> (T*TB, 8) keeps the 8-lane minor dim -> tile-aligned relayout.
    x_flat = x_ref[...].reshape(T * TB, F)
    xw_ref[...] = (
        jnp.dot(x_flat, wih_ref[...], preferred_element_type=jnp.float32) + b_ref[...]
    )

    whh = whh_ref[...]
    h0 = jnp.zeros((TB, H), jnp.float32)
    c0 = jnp.zeros((TB, H), jnp.float32)

    def step(t, carry):
        h, c = carry
        row = pl.multiple_of(t * TB, 8)
        gates = xw_ref[pl.ds(row, TB), :] + jnp.dot(
            h, whh, preferred_element_type=jnp.float32
        )
        sg = jax.nn.sigmoid(gates)
        tg = jnp.tanh(gates)
        i = sg[:, 0 * H:1 * H]
        f = sg[:, 1 * H:2 * H]
        g = tg[:, 2 * H:3 * H]
        o = sg[:, 3 * H:4 * H]
        c_new = f * c + i * g
        h_new = o * jnp.tanh(c_new)
        return (h_new, c_new)

    # TB <= 32 -> small live set -> full unroll is safe and gives LLO visibility.
    h_final, _ = lax.fori_loop(0, T, step, (h0, c0), unroll=True)

    # fc(32 -> 1) + sigmoid as a VPU multiply + lane reduction (no N=1 MXU matmul).
    logits = jnp.sum(h_final * fcw_ref[...], axis=-1, keepdims=True) + fcb_ref[...]
    out_ref[...] = jax.nn.sigmoid(logits)


def _forward_small(x, params):
    w_ih, w_hh, b_ih, b_hh, fc_w, fc_b = params
    B, T, F = x.shape

    B_pad8 = _round_up(B, 8)
    if B >= 16:
        # >= 2 grid blocks so a v7x megacore has work on both TensorCores.
        TB = _round_up((B + 1) // 2, 8)
    else:
        TB = B_pad8
    B_pad = _round_up(B, TB)

    x_tm = jnp.transpose(x, (1, 0, 2)).astype(jnp.float32)            # (T, B, 6)
    x_tm = jnp.pad(x_tm, ((0, 0), (0, B_pad - B), (0, F_PAD - F)))    # (T, B_pad, 8)

    wih_t = jnp.pad(w_ih.T.astype(jnp.float32), ((0, F_PAD - F), (0, 0)))  # (8, 128)
    whh_t = w_hh.T.astype(jnp.float32)                                     # (32, 128)
    bias = (b_ih + b_hh).astype(jnp.float32)[None, :]                      # (1, 128)
    fcw_row = fc_w.astype(jnp.float32)                                     # (1, 32)
    fcb = fc_b.astype(jnp.float32)[None, :]                                # (1, 1)

    out = pl.pallas_call(
        _lstm_head_kernel_small,
        out_shape=jax.ShapeDtypeStruct((B_pad, 1), jnp.float32),
        grid=(B_pad // TB,),
        in_specs=[
            pl.BlockSpec((T, TB, F_PAD), lambda i: (0, i, 0)),        # x tile
            pl.BlockSpec((F_PAD, 4 * HIDDEN), lambda i: (0, 0)),      # W_ih^T
            pl.BlockSpec((HIDDEN, 4 * HIDDEN), lambda i: (0, 0)),     # W_hh^T
            pl.BlockSpec((1, 4 * HIDDEN), lambda i: (0, 0)),          # bias
            pl.BlockSpec((1, HIDDEN), lambda i: (0, 0)),              # fc weight
            pl.BlockSpec((1, 1), lambda i: (0, 0)),                   # fc bias
        ],
        out_specs=pl.BlockSpec((TB, 1), lambda i: (i, 0)),
        scratch_shapes=[pltpu.VMEM((T * TB, 4 * HIDDEN), jnp.float32)],
        compiler_params=pltpu.CompilerParams(
            dimension_semantics=("parallel",),
        ),
    )(x_tm, wih_t, whh_t, bias, fcw_row, fcb)
    return out[:B]


# --------------------------------------------------------------------------------------
# Path T: batched (B > 64).  Batch tile sits in the 128-lane axis; gates are (4H, TB)
# and are sliced along sublanes so only i/f/o get sigmoid and only g / c get tanh.
# --------------------------------------------------------------------------------------
def _lstm_head_kernel_lane(x_ref, wih_ref, whh_ref, b_ref, fcw_ref, fcb_ref,
                           out_ref, xw_ref):
    """x_ref:   (T, F_PAD, TB)   lane-dense input tile (batch in lanes)
       wih_ref: (4H, F_PAD)      input->gates weights (gate order i,f,g,o)
       whh_ref: (4H, H)          hidden->gates weights
       b_ref:   (4H, 1)          b_ih + b_hh (column, broadcast over lanes)
       fcw_ref: (H, 1)           final linear weight column
       fcb_ref: (1, 1)           final linear bias
       out_ref: (1, TB)          sigmoid(fc(h_T)), lane-dense
       xw_ref:  (T, 4H, TB) VMEM precomputed input projection (transposed)."""
    T, F, TB = x_ref.shape
    H = whh_ref.shape[1]

    wih = wih_ref[...]
    bias = b_ref[...]

    # Pre-pass (off the serial h->h chain): xwT[t] = W_ih @ x_t + b for every t.
    @pl.loop(0, T)
    def _(t):
        xw_ref[t] = jnp.dot(wih, x_ref[t], preferred_element_type=jnp.float32) + bias

    whh = whh_ref[...]
    h0 = jnp.zeros((H, TB), jnp.float32)
    c0 = jnp.zeros((H, TB), jnp.float32)

    def step(t, carry):
        hT, cT = carry
        # Per-step critical path: one (4H,H)x(H,TB) MXU matmul + dense VPU/EUP work.
        gT = xw_ref[t] + jnp.dot(whh, hT, preferred_element_type=jnp.float32)
        # Static sublane slices (gate order i, f, g, o): sigmoid only on i/f/o
        # (12 dense vregs at TB=128), tanh only on g (4) and on c_new (4).
        i = jax.nn.sigmoid(gT[0 * H:1 * H, :])
        f = jax.nn.sigmoid(gT[1 * H:2 * H, :])
        g = jnp.tanh(gT[2 * H:3 * H, :])
        o = jax.nn.sigmoid(gT[3 * H:4 * H, :])
        c_new = f * cT + i * g
        h_new = o * jnp.tanh(c_new)
        return (h_new, c_new)

    # Partial unroll: scheduler sees a few steps (overlaps the xwT[t] load and the
    # independent x-side work) without the spill cliff of a 50-step full unroll.
    h_final, _ = lax.fori_loop(0, T, step, (h0, c0), unroll=4)

    # fc(32 -> 1) + sigmoid: VPU multiply + sublane (XLU) reduce -> lane-dense (1, TB).
    logits = jnp.sum(h_final * fcw_ref[...], axis=0, keepdims=True) + fcb_ref[...]
    out_ref[...] = jax.nn.sigmoid(logits)


def _forward_batched(x, params):
    w_ih, w_hh, b_ih, b_hh, fc_w, fc_b = params
    B, T, F = x.shape

    if B <= 128:
        TB = _round_up(B, 8)      # single block; block last dim == full array dim
    else:
        TB = 128                  # multiple blocks; lane-dim multiple of 128
    B_pad = _round_up(B, TB)

    # Glue: time-major, features on sublanes (padded 6->8), batch on lanes.
    x_tm = jnp.transpose(x, (1, 2, 0)).astype(jnp.float32)            # (T, 6, B)
    x_tm = jnp.pad(x_tm, ((0, 0), (0, F_PAD - F), (0, B_pad - B)))    # (T, 8, B_pad)

    wih_p = jnp.pad(w_ih.astype(jnp.float32), ((0, 0), (0, F_PAD - F)))  # (128, 8)
    whh = w_hh.astype(jnp.float32)                                       # (128, 32)
    bias = (b_ih + b_hh).astype(jnp.float32)[:, None]                    # (128, 1)
    fcw_col = fc_w.astype(jnp.float32).T                                 # (32, 1)
    fcb = fc_b.astype(jnp.float32)[None, :]                              # (1, 1)

    out = pl.pallas_call(
        _lstm_head_kernel_lane,
        out_shape=jax.ShapeDtypeStruct((1, B_pad), jnp.float32),
        grid=(B_pad // TB,),
        in_specs=[
            pl.BlockSpec((T, F_PAD, TB), lambda i: (0, 0, i)),          # x tile
            pl.BlockSpec((4 * HIDDEN, F_PAD), lambda i: (0, 0)),        # W_ih (padded)
            pl.BlockSpec((4 * HIDDEN, HIDDEN), lambda i: (0, 0)),       # W_hh
            pl.BlockSpec((4 * HIDDEN, 1), lambda i: (0, 0)),            # bias column
            pl.BlockSpec((HIDDEN, 1), lambda i: (0, 0)),                # fc weight col
            pl.BlockSpec((1, 1), lambda i: (0, 0)),                     # fc bias
        ],
        out_specs=pl.BlockSpec((1, TB), lambda i: (0, i)),              # lane-dense out
        scratch_shapes=[pltpu.VMEM((T, 4 * HIDDEN, TB), jnp.float32)],
        compiler_params=pltpu.CompilerParams(
            dimension_semantics=("parallel",),   # shard batch tiles across TCs (v7x)
        ),
    )(x_tm, wih_p, whh, bias, fcw_col, fcb)
    return out[0, :B][:, None]


def stacking_classifier_forward(x, params):
    """x: (B, T, 6) float32. Returns sigmoid(fc(h_T)) of shape (B, 1)."""
    B, T, F = x.shape
    assert F == INPUT_SIZE
    if B <= SMALL_BATCH_MAX:
        return _forward_small(x, params)
    return _forward_batched(x, params)


# --------------------------------------------------------------------------------------
# Params / reference
# --------------------------------------------------------------------------------------
def init_params(key):
    """Deterministic init mirroring PyTorch shapes: uniform(-1/sqrt(H), 1/sqrt(H))."""
    k = 1.0 / jnp.sqrt(jnp.float32(HIDDEN))
    ks = jax.random.split(key, 6)
    w_ih = jax.random.uniform(ks[0], (4 * HIDDEN, INPUT_SIZE), jnp.float32, -k, k)
    w_hh = jax.random.uniform(ks[1], (4 * HIDDEN, HIDDEN), jnp.float32, -k, k)
    b_ih = jax.random.uniform(ks[2], (4 * HIDDEN,), jnp.float32, -k, k)
    b_hh = jax.random.uniform(ks[3], (4 * HIDDEN,), jnp.float32, -k, k)
    fc_w = jax.random.uniform(ks[4], (1, HIDDEN), jnp.float32, -k, k)
    fc_b = jax.random.uniform(ks[5], (1,), jnp.float32, -k, k)
    return (w_ih, w_hh, b_ih, b_hh, fc_w, fc_b)


def reference_forward(x, params):
    """Pure-JAX reference of the PyTorch forward (for correctness check)."""
    w_ih, w_hh, b_ih, b_hh, fc_w, fc_b = params
    B, T, _ = x.shape
    h = jnp.zeros((B, HIDDEN), jnp.float32)
    c = jnp.zeros((B, HIDDEN), jnp.float32)
    for t in range(T):
        gates = x[:, t, :] @ w_ih.T + h @ w_hh.T + b_ih + b_hh
        i = jax.nn.sigmoid(gates[:, 0 * HIDDEN:1 * HIDDEN])
        f = jax.nn.sigmoid(gates[:, 1 * HIDDEN:2 * HIDDEN])
        g = jnp.tanh(gates[:, 2 * HIDDEN:3 * HIDDEN])
        o = jax.nn.sigmoid(gates[:, 3 * HIDDEN:4 * HIDDEN])
        c = f * c + i * g
        h = o * jnp.tanh(c)
    return jax.nn.sigmoid(h @ fc_w.T + fc_b)


if __name__ == "__main__":
    key = jax.random.PRNGKey(0)
    k_params, k_x1, k_x2 = jax.random.split(key, 3)
    params = init_params(k_params)

    # Small-batch path (same kernel class as the module's predict(): B=1, T=50, F=6).
    B1, T1 = 2, 8
    x_small = jax.random.normal(k_x1, (B1, T1, INPUT_SIZE), dtype=jnp.float32)
    out_s = jax.block_until_ready(stacking_classifier_forward(x_small, params))
    ref_s = reference_forward(x_small, params)
    assert out_s.shape == (B1, 1)
    assert jnp.allclose(out_s, ref_s, atol=2e-5, rtol=2e-5), (out_s, ref_s)

    # Batched ("batch-in-lanes" transposed) path.
    B2, T2 = 96, 8
    x_big = jax.random.normal(k_x2, (B2, T2, INPUT_SIZE), dtype=jnp.float32)
    out_b = jax.block_until_ready(stacking_classifier_forward(x_big, params))
    ref_b = reference_forward(x_big, params)
    assert out_b.shape == (B2, 1)
    assert jnp.allclose(out_b, ref_b, atol=2e-5, rtol=2e-5), (out_b, ref_b)

    print("KERNEL_OK")
</pallas_src>

<mosaic_0001>
module attributes {stable_mosaic.version = 11 : i64} {
  func.func @_lstm_head_kernel_small(%arg0: i32, %arg1: memref<8x8x8xf32, #tpu.memory_space<vmem>>, %arg2: memref<8x128xf32, #tpu.memory_space<vmem>>, %arg3: memref<32x128xf32, #tpu.memory_space<vmem>>, %arg4: memref<1x128xf32, #tpu.memory_space<vmem>>, %arg5: memref<1x32xf32, #tpu.memory_space<vmem>>, %arg6: memref<1x1xf32, #tpu.memory_space<vmem>>, %arg7: memref<8x1xf32, #tpu.memory_space<vmem>>, %arg8: memref<64x128xf32, #tpu.memory_space<vmem>>) attributes {dimension_semantics = [#tpu.dimension_semantics<parallel>], iteration_bounds = array<i64: 1>, scalar_prefetch = 0 : i64, scratch_operands = 1 : i64, tpu.core_type = #tpu.core_type<tc>, window_params = [{transform_indices = @transform_0, window_bounds = array<i64: 8, 8, 8>}, {pipeline_mode = #tpu.pipeline_mode<synchronous>, transform_indices = @transform_1, window_bounds = array<i64: 8, 128>}, {pipeline_mode = #tpu.pipeline_mode<synchronous>, transform_indices = @transform_2, window_bounds = array<i64: 32, 128>}, {pipeline_mode = #tpu.pipeline_mode<synchronous>, transform_indices = @transform_3, window_bounds = array<i64: 1, 128>}, {pipeline_mode = #tpu.pipeline_mode<synchronous>, transform_indices = @transform_4, window_bounds = array<i64: 1, 32>}, {pipeline_mode = #tpu.pipeline_mode<synchronous>, transform_indices = @transform_5, window_bounds = array<i64: 1, 1>}, {transform_indices = @transform_6, window_bounds = array<i64: 8, 1>}]} {
    %c0 = arith.constant 0 : index
    %c0_0 = arith.constant 0 : index
    %c0_1 = arith.constant 0 : index
    %0 = vector.load %arg1[%c0, %c0_0, %c0_1] : memref<8x8x8xf32, #tpu.memory_space<vmem>>, vector<8x8x8xf32>
    %1 = vector.shape_cast %0 : vector<8x8x8xf32> to vector<64x8xf32>
    %c0_2 = arith.constant 0 : index
    %c0_3 = arith.constant 0 : index
    %2 = vector.load %arg2[%c0_2, %c0_3] : memref<8x128xf32, #tpu.memory_space<vmem>>, vector<8x128xf32>
    %cst = arith.constant dense<0.000000e+00> : vector<64x128xf32>
    %3 = tpu.matmul %1, %2, %cst {dimension_numbers = #tpu.dot_dimension_numbers<[1], [0], [0], [1], [0, 0, 1, 1], [], []>} : vector<64x8xf32>, vector<8x128xf32>, vector<64x128xf32> -> vector<64x128xf32>
    %c0_4 = arith.constant 0 : index
    %c0_5 = arith.constant 0 : index
    %4 = vector.load %arg4[%c0_4, %c0_5] : memref<1x128xf32, #tpu.memory_space<vmem>>, vector<1x128xf32>
    %5 = vector.broadcast %4 : vector<1x128xf32> to vector<64x128xf32>
    %6 = arith.addf %3, %5 : vector<64x128xf32>
    %c0_6 = arith.constant 0 : index
    %c0_7 = arith.constant 0 : index
    %7 = vector.load %arg8[%c0_6, %c0_7] : memref<64x128xf32, #tpu.memory_space<vmem>>, vector<64x128xf32>
    tpu.vector_store %arg8[%c0_6, %c0_7], %6 {strides = array<i32>} : memref<64x128xf32, #tpu.memory_space<vmem>>, vector<64x128xf32>,
    %c0_8 = arith.constant 0 : index
    %c0_9 = arith.constant 0 : index
    %8 = vector.load %arg3[%c0_8, %c0_9] : memref<32x128xf32, #tpu.memory_space<vmem>>, vector<32x128xf32>
    %cst_10 = arith.constant 0.000000e+00 : f32
    %9 = vector.broadcast %cst_10 : f32 to vector<8x32xf32>
    %cst_11 = arith.constant 0.000000e+00 : f32
    %10 = vector.broadcast %cst_11 : f32 to vector<8x32xf32>
    %c0_i32 = arith.constant 0 : i32
    %c8_i32 = arith.constant 8 : i32
    %11 = arith.muli %c0_i32, %c8_i32 : i32
    %12 = tpu.assume_multiple %11, 8 : i32
    %13 = arith.index_cast %12 : i32 to index
    %c0_12 = arith.constant 0 : index
    %14 = vector.load %arg8[%13, %c0_12] : memref<64x128xf32, #tpu.memory_space<vmem>>, vector<8x128xf32>
    %cst_13 = arith.constant dense<0.000000e+00> : vector<8x128xf32>
    %15 = tpu.matmul %9, %8, %cst_13 {dimension_numbers = #tpu.dot_dimension_numbers<[1], [0], [0], [1], [0, 0, 1, 1], [], []>} : vector<8x32xf32>, vector<32x128xf32>, vector<8x128xf32> -> vector<8x128xf32>
    %16 = arith.addf %14, %15 : vector<8x128xf32>
    %17 = arith.negf %16 : vector<8x128xf32>
    %18 = math.exp %17 : vector<8x128xf32>
    %cst_14 = arith.constant 1.000000e+00 : f32
    %19 = vector.broadcast %cst_14 : f32 to vector<8x128xf32>
    %20 = arith.addf %19, %18 : vector<8x128xf32>
    %21 = arith.divf %19, %20 : vector<8x128xf32>
    %22 = math.tanh %16 : vector<8x128xf32>
    %23 = vector.extract_strided_slice %21 {offsets = [0, 0], sizes = [8, 32], strides = [1, 1]} : vector<8x128xf32> to vector<8x32xf32>
    %24 = vector.extract_strided_slice %21 {offsets = [0, 32], sizes = [8, 32], strides = [1, 1]} : vector<8x128xf32> to vector<8x32xf32>
    %25 = vector.extract_strided_slice %22 {offsets = [0, 64], sizes = [8, 32], strides = [1, 1]} : vector<8x128xf32> to vector<8x32xf32>
    %26 = vector.extract_strided_slice %21 {offsets = [0, 96], sizes = [8, 32], strides = [1, 1]} : vector<8x128xf32> to vector<8x32xf32>
    %27 = arith.mulf %24, %10 : vector<8x32xf32>
    %28 = arith.mulf %23, %25 : vector<8x32xf32>
    %29 = arith.addf %27, %28 : vector<8x32xf32>
    %30 = math.tanh %29 : vector<8x32xf32>
    %31 = arith.mulf %26, %30 : vector<8x32xf32>
    %c1_i32 = arith.constant 1 : i32
    %c8_i32_15 = arith.constant 8 : i32
    %32 = arith.muli %c1_i32, %c8_i32_15 : i32
    %33 = tpu.assume_multiple %32, 8 : i32
    %34 = arith.index_cast %33 : i32 to index
    %c0_16 = arith.constant 0 : index
    %35 = vector.load %arg8[%34, %c0_16] : memref<64x128xf32, #tpu.memory_space<vmem>>, vector<8x128xf32>
    %cst_17 = arith.constant dense<0.000000e+00> : vector<8x128xf32>
    %36 = tpu.matmul %31, %8, %cst_17 {dimension_numbers = #tpu.dot_dimension_numbers<[1], [0], [0], [1], [0, 0, 1, 1], [], []>} : vector<8x32xf32>, vector<32x128xf32>, vector<8x128xf32> -> vector<8x128xf32>
    %37 = arith.addf %35, %36 : vector<8x128xf32>
    %38 = arith.negf %37 : vector<8x128xf32>
    %39 = math.exp %38 : vector<8x128xf32>
    %cst_18 = arith.constant 1.000000e+00 : f32
    %40 = vector.broadcast %cst_18 : f32 to vector<8x128xf32>
    %41 = arith.addf %40, %39 : vector<8x128xf32>
    %42 = arith.divf %40, %41 : vector<8x128xf32>
    %43 = math.tanh %37 : vector<8x128xf32>
    %44 = vector.extract_strided_slice %42 {offsets = [0, 0], sizes = [8, 32], strides = [1, 1]} : vector<8x128xf32> to vector<8x32xf32>
    %45 = vector.extract_strided_slice %42 {offsets = [0, 32], sizes = [8, 32], strides = [1, 1]} : vector<8x128xf32> to vector<8x32xf32>
    %46 = vector.extract_strided_slice %43 {offsets = [0, 64], sizes = [8, 32], strides = [1, 1]} : vector<8x128xf32> to vector<8x32xf32>
    %47 = vector.extract_strided_slice %42 {offsets = [0, 96], sizes = [8, 32], strides = [1, 1]} : vector<8x128xf32> to vector<8x32xf32>
    %48 = arith.mulf %45, %29 : vector<8x32xf32>
    %49 = arith.mulf %44, %46 : vector<8x32xf32>
    %50 = arith.addf %48, %49 : vector<8x32xf32>
    %51 = math.tanh %50 : vector<8x32xf32>
    %52 = arith.mulf %47, %51 : vector<8x32xf32>
    %c2_i32 = arith.constant 2 : i32
    %c8_i32_19 = arith.constant 8 : i32
    %53 = arith.muli %c2_i32, %c8_i32_19 : i32
    %54 = tpu.assume_multiple %53, 8 : i32
    %55 = arith.index_cast %54 : i32 to index
    %c0_20 = arith.constant 0 : index
    %56 = vector.load %arg8[%55, %c0_20] : memref<64x128xf32, #tpu.memory_space<vmem>>, vector<8x128xf32>
    %cst_21 = arith.constant dense<0.000000e+00> : vector<8x128xf32>
    %57 = tpu.matmul %52, %8, %cst_21 {dimension_numbers = #tpu.dot_dimension_numbers<[1], [0], [0], [1], [0, 0, 1, 1], [], []>} : vector<8x32xf32>, vector<32x128xf32>, vector<8x128xf32> -> vector<8x128xf32>
    %58 = arith.addf %56, %57 : vector<8x128xf32>
    %59 = arith.negf %58 : vector<8x128xf32>
    %60 = math.exp %59 : vector<8x128xf32>
    %cst_22 = arith.constant 1.000000e+00 : f32
    %61 = vector.broadcast %cst_22 : f32 to vector<8x128xf32>
    %62 = arith.addf %61, %60 : vector<8x128xf32>
    %63 = arith.divf %61, %62 : vector<8x128xf32>
    %64 = math.tanh %58 : vector<8x128xf32>
    %65 = vector.extract_strided_slice %63 {offsets = [0, 0], sizes = [8, 32], strides = [1, 1]} : vector<8x128xf32> to vector<8x32xf32>
    %66 = vector.extract_strided_slice %63 {offsets = [0, 32], sizes = [8, 32], strides = [1, 1]} : vector<8x128xf32> to vector<8x32xf32>
    %67 = vector.extract_strided_slice %64 {offsets = [0, 64], sizes = [8, 32], strides = [1, 1]} : vector<8x128xf32> to vector<8x32xf32>
    %68 = vector.extract_strided_slice %63 {offsets = [0, 96], sizes = [8, 32], strides = [1, 1]} : vector<8x128xf32> to vector<8x32xf32>
    %69 = arith.mulf %66, %50 : vector<8x32xf32>
    %70 = arith.mulf %65, %67 : vector<8x32xf32>
    %71 = arith.addf %69, %70 : vector<8x32xf32>
    %72 = math.tanh %71 : vector<8x32xf32>
    %73 = arith.mulf %68, %72 : vector<8x32xf32>
    %c3_i32 = arith.constant 3 : i32
    %c8_i32_23 = arith.constant 8 : i32
    %74 = arith.muli %c3_i32, %c8_i32_23 : i32
    %75 = tpu.assume_multiple %74, 8 : i32
    %76 = arith.index_cast %75 : i32 to index
    %c0_24 = arith.constant 0 : index
    %77 = vector.load %arg8[%76, %c0_24] : memref<64x128xf32, #tpu.memory_space<vmem>>, vector<8x128xf32>
    %cst_25 = arith.constant dense<0.000000e+00> : vector<8x128xf32>
    %78 = tpu.matmul %73, %8, %cst_25 {dimension_numbers = #tpu.dot_dimension_numbers<[1], [0], [0], [1], [0, 0, 1, 1], [], []>} : vector<8x32xf32>, vector<32x128xf32>, vector<8x128xf32> -> vector<8x128xf32>
    %79 = arith.addf %77, %78 : vector<8x128xf32>
    %80 = arith.negf %79 : vector<8x128xf32>
    %81 = math.exp %80 : vector<8x128xf32>
    %cst_26 = arith.constant 1.000000e+00 : f32
    %82 = vector.broadcast %cst_26 : f32 to vector<8x128xf32>
    %83 = arith.addf %82, %81 : vector<8x128xf32>
    %84 = arith.divf %82, %83 : vector<8x128xf32>
    %85 = math.tanh %79 : vector<8x128xf32>
    %86 = vector.extract_strided_slice %84 {offsets = [0, 0], sizes = [8, 32], strides = [1, 1]} : vector<8x128xf32> to vector<8x32xf32>
    %87 = vector.extract_strided_slice %84 {offsets = [0, 32], sizes = [8, 32], strides = [1, 1]} : vector<8x128xf32> to vector<8x32xf32>
    %88 = vector.extract_strided_slice %85 {offsets = [0, 64], sizes = [8, 32], strides = [1, 1]} : vector<8x128xf32> to vector<8x32xf32>
    %89 = vector.extract_strided_slice %84 {offsets = [0, 96], sizes = [8, 32], strides = [1, 1]} : vector<8x128xf32> to vector<8x32xf32>
    %90 = arith.mulf %87, %71 : vector<8x32xf32>
    %91 = arith.mulf %86, %88 : vector<8x32xf32>
    %92 = arith.addf %90, %91 : vector<8x32xf32>
    %93 = math.tanh %92 : vector<8x32xf32>
    %94 = arith.mulf %89, %93 : vector<8x32xf32>
    %c4_i32 = arith.constant 4 : i32
    %c8_i32_27 = arith.constant 8 : i32
    %95 = arith.muli %c4_i32, %c8_i32_27 : i32
    %96 = tpu.assume_multiple %95, 8 : i32
    %97 = arith.index_cast %96 : i32 to index
    %c0_28 = arith.constant 0 : index
    %98 = vector.load %arg8[%97, %c0_28] : memref<64x128xf32, #tpu.memory_space<vmem>>, vector<8x128xf32>
    %cst_29 = arith.constant dense<0.000000e+00> : vector<8x128xf32>
    %99 = tpu.matmul %94, %8, %cst_29 {dimension_numbers = #tpu.dot_dimension_numbers<[1], [0], [0], [1], [0, 0, 1, 1], [], []>} : vector<8x32xf32>, vector<32x128xf32>, vector<8x128xf32> -> vector<8x128xf32>
    %100 = arith.addf %98, %99 : vector<8x128xf32>
    %101 = arith.negf %100 : vector<8x128xf32>
    %102 = math.exp %101 : vector<8x128xf32>
    %cst_30 = arith.constant 1.000000e+00 : f32
    %103 = vector.broadcast %cst_30 : f32 to vector<8x128xf32>
    %104 = arith.addf %103, %102 : vector<8x128xf32>
    %105 = arith.divf %103, %104 : vector<8x128xf32>
    %106 = math.tanh %100 : vector<8x128xf32>
    %107 = vector.extract_strided_slice %105 {offsets = [0, 0], sizes = [8, 32], strides = [1, 1]} : vector<8x128xf32> to vector<8x32xf32>
    %108 = vector.extract_strided_slice %105 {offsets = [0, 32], sizes = [8, 32], strides = [1, 1]} : vector<8x128xf32> to vector<8x32xf32>
    %109 = vector.extract_strided_slice %106 {offsets = [0, 64], sizes = [8, 32], strides = [1, 1]} : vector<8x128xf32> to vector<8x32xf32>
    %110 = vector.extract_strided_slice %105 {offsets = [0, 96], sizes = [8, 32], strides = [1, 1]} : vector<8x128xf32> to vector<8x32xf32>
    %111 = arith.mulf %108, %92 : vector<8x32xf32>
    %112 = arith.mulf %107, %109 : vector<8x32xf32>
    %113 = arith.addf %111, %112 : vector<8x32xf32>
    %114 = math.tanh %113 : vector<8x32xf32>
    %115 = arith.mulf %110, %114 : vector<8x32xf32>
    %c5_i32 = arith.constant 5 : i32
    %c8_i32_31 = arith.constant 8 : i32
    %116 = arith.muli %c5_i32, %c8_i32_31 : i32
    %117 = tpu.assume_multiple %116, 8 : i32
    %118 = arith.index_cast %117 : i32 to index
    %c0_32 = arith.constant 0 : index
    %119 = vector.load %arg8[%118, %c0_32] : memref<64x128xf32, #tpu.memory_space<vmem>>, vector<8x128xf32>
    %cst_33 = arith.constant dense<0.000000e+00> : vector<8x128xf32>
    %120 = tpu.matmul %115, %8, %cst_33 {dimension_numbers = #tpu.dot_dimension_numbers<[1], [0], [0], [1], [0, 0, 1, 1], [], []>} : vector<8x32xf32>, vector<32x128xf32>, vector<8x128xf32> -> vector<8x128xf32>
    %121 = arith.addf %119, %120 : vector<8x128xf32>
    %122 = arith.negf %121 : vector<8x128xf32>
    %123 = math.exp %122 : vector<8x128xf32>
    %cst_34 = arith.constant 1.000000e+00 : f32
    %124 = vector.broadcast %cst_34 : f32 to vector<8x128xf32>
    %125 = arith.addf %124, %123 : vector<8x128xf32>
    %126 = arith.divf %124, %125 : vector<8x128xf32>
    %127 = math.tanh %121 : vector<8x128xf32>
    %128 = vector.extract_strided_slice %126 {offsets = [0, 0], sizes = [8, 32], strides = [1, 1]} : vector<8x128xf32> to vector<8x32xf32>
    %129 = vector.extract_strided_slice %126 {offsets = [0, 32], sizes = [8, 32], strides = [1, 1]} : vector<8x128xf32> to vector<8x32xf32>
    %130 = vector.extract_strided_slice %127 {offsets = [0, 64], sizes = [8, 32], strides = [1, 1]} : vector<8x128xf32> to vector<8x32xf32>
    %131 = vector.extract_strided_slice %126 {offsets = [0, 96], sizes = [8, 32], strides = [1, 1]} : vector<8x128xf32> to vector<8x32xf32>
    %132 = arith.mulf %129, %113 : vector<8x32xf32>
    %133 = arith.mulf %128, %130 : vector<8x32xf32>
    %134 = arith.addf %132, %133 : vector<8x32xf32>
    %135 = math.tanh %134 : vector<8x32xf32>
    %136 = arith.mulf %131, %135 : vector<8x32xf32>
    %c6_i32 = arith.constant 6 : i32
    %c8_i32_35 = arith.constant 8 : i32
    %137 = arith.muli %c6_i32, %c8_i32_35 : i32
    %138 = tpu.assume_multiple %137, 8 : i32
    %139 = arith.index_cast %138 : i32 to index
    %c0_36 = arith.constant 0 : index
    %140 = vector.load %arg8[%139, %c0_36] : memref<64x128xf32, #tpu.memory_space<vmem>>, vector<8x128xf32>
    %cst_37 = arith.constant dense<0.000000e+00> : vector<8x128xf32>
    %141 = tpu.matmul %136, %8, %cst_37 {dimension_numbers = #tpu.dot_dimension_numbers<[1], [0], [0], [1], [0, 0, 1, 1], [], []>} : vector<8x32xf32>, vector<32x128xf32>, vector<8x128xf32> -> vector<8x128xf32>
    %142 = arith.addf %140, %141 : vector<8x128xf32>
    %143 = arith.negf %142 : vector<8x128xf32>
    %144 = math.exp %143 : vector<8x128xf32>
    %cst_38 = arith.constant 1.000000e+00 : f32
    %145 = vector.broadcast %cst_38 : f32 to vector<8x128xf32>
    %146 = arith.addf %145, %144 : vector<8x128xf32>
    %147 = arith.divf %145, %146 : vector<8x128xf32>
    %148 = math.tanh %142 : vector<8x128xf32>
    %149 = vector.extract_strided_slice %147 {offsets = [0, 0], sizes = [8, 32], strides = [1, 1]} : vector<8x128xf32> to vector<8x32xf32>
    %150 = vector.extract_strided_slice %147 {offsets = [0, 32], sizes = [8, 32], strides = [1, 1]} : vector<8x128xf32> to vector<8x32xf32>
    %151 = vector.extract_strided_slice %148 {offsets = [0, 64], sizes = [8, 32], strides = [1, 1]} : vector<8x128xf32> to vector<8x32xf32>
    %152 = vector.extract_strided_slice %147 {offsets = [0, 96], sizes = [8, 32], strides = [1, 1]} : vector<8x128xf32> to vector<8x32xf32>
    %153 = arith.mulf %150, %134 : vector<8x32xf32>
    %154 = arith.mulf %149, %151 : vector<8x32xf32>
    %155 = arith.addf %153, %154 : vector<8x32xf32>
    %156 = math.tanh %155 : vector<8x32xf32>
    %157 = arith.mulf %152, %156 : vector<8x32xf32>
    %c7_i32 = arith.constant 7 : i32
    %c8_i32_39 = arith.constant 8 : i32
    %158 = arith.muli %c7_i32, %c8_i32_39 : i32
    %159 = tpu.assume_multiple %158, 8 : i32
    %160 = arith.index_cast %159 : i32 to index
    %c0_40 = arith.constant 0 : index
    %161 = vector.load %arg8[%160, %c0_40] : memref<64x128xf32, #tpu.memory_space<vmem>>, vector<8x128xf32>
    %cst_41 = arith.constant dense<0.000000e+00> : vector<8x128xf32>
    %162 = tpu.matmul %157, %8, %cst_41 {dimension_numbers = #tpu.dot_dimension_numbers<[1], [0], [0], [1], [0, 0, 1, 1], [], []>} : vector<8x32xf32>, vector<32x128xf32>, vector<8x128xf32> -> vector<8x128xf32>
    %163 = arith.addf %161, %162 : vector<8x128xf32>
    %164 = arith.negf %163 : vector<8x128xf32>
    %165 = math.exp %164 : vector<8x128xf32>
    %cst_42 = arith.constant 1.000000e+00 : f32
    %166 = vector.broadcast %cst_42 : f32 to vector<8x128xf32>
    %167 = arith.addf %166, %165 : vector<8x128xf32>
    %168 = arith.divf %166, %167 : vector<8x128xf32>
    %169 = math.tanh %163 : vector<8x128xf32>
    %170 = vector.extract_strided_slice %168 {offsets = [0, 0], sizes = [8, 32], strides = [1, 1]} : vector<8x128xf32> to vector<8x32xf32>
    %171 = vector.extract_strided_slice %168 {offsets = [0, 32], sizes = [8, 32], strides = [1, 1]} : vector<8x128xf32> to vector<8x32xf32>
    %172 = vector.extract_strided_slice %169 {offsets = [0, 64], sizes = [8, 32], strides = [1, 1]} : vector<8x128xf32> to vector<8x32xf32>
    %173 = vector.extract_strided_slice %168 {offsets = [0, 96], sizes = [8, 32], strides = [1, 1]} : vector<8x128xf32> to vector<8x32xf32>
    %174 = arith.mulf %171, %155 : vector<8x32xf32>
    %175 = arith.mulf %170, %172 : vector<8x32xf32>
    %176 = arith.addf %174, %175 : vector<8x32xf32>
    %177 = math.tanh %176 : vector<8x32xf32>
    %178 = arith.mulf %173, %177 : vector<8x32xf32>
    %c8_i32_43 = arith.constant 8 : i32
    %c0_44 = arith.constant 0 : index
    %c0_45 = arith.constant 0 : index
    %179 = vector.load %arg5[%c0_44, %c0_45] : memref<1x32xf32, #tpu.memory_space<vmem>>, vector<1x32xf32>
    %180 = vector.broadcast %179 : vector<1x32xf32> to vector<8x32xf32>
    %181 = arith.mulf %178, %180 : vector<8x32xf32>
    %cst_46 = arith.constant dense<0.000000e+00> : vector<8xf32>
    %182 = vector.multi_reduction <add>, %181, %cst_46 [1] : vector<8x32xf32> to vector<8xf32>
    %183 = vector.shape_cast %182 : vector<8xf32> to vector<8x1xf32>
    %c0_47 = arith.constant 0 : index
    %c0_48 = arith.constant 0 : index
    %184 = vector.load %arg6[%c0_47, %c0_48] : memref<1x1xf32, #tpu.memory_space<vmem>>, vector<1x1xf32>
    %185 = vector.broadcast %184 : vector<1x1xf32> to vector<8x1xf32>
    %186 = arith.addf %183, %185 : vector<8x1xf32>
    %187 = arith.negf %186 : vector<8x1xf32>
    %188 = math.exp %187 : vector<8x1xf32>
    %cst_49 = arith.constant 1.000000e+00 : f32
    %189 = vector.broadcast %cst_49 : f32 to vector<8x1xf32>
    %190 = arith.addf %189, %188 : vector<8x1xf32>
    %191 = arith.divf %189, %190 : vector<8x1xf32>
    %c0_50 = arith.constant 0 : index
    %c0_51 = arith.constant 0 : index
    %192 = vector.load %arg7[%c0_50, %c0_51] : memref<8x1xf32, #tpu.memory_space<vmem>>, vector<8x1xf32>
    tpu.vector_store %arg7[%c0_50, %c0_51], %191 {strides = array<i32>} : memref<8x1xf32, #tpu.memory_space<vmem>>, vector<8x1xf32>,
    return
  }
  func.func @transform_0(%arg0: i32) -> (i32, i32, i32) {
    %c0_i32 = arith.constant 0 : i32
    %c0_i32_0 = arith.constant 0 : i32
    %c0_i32_1 = arith.constant 0 : i32
    return %c0_i32, %arg0, %c0_i32_0 : i32, i32, i32
  }
  func.func @transform_1(%arg0: i32) -> (i32, i32) {
    %c0_i32 = arith.constant 0 : i32
    %c0_i32_0 = arith.constant 0 : i32
    %c0_i32_1 = arith.constant 0 : i32
    return %c0_i32, %c0_i32_0 : i32, i32
  }
  func.func @transform_2(%arg0: i32) -> (i32, i32) {
    %c0_i32 = arith.constant 0 : i32
    %c0_i32_0 = arith.constant 0 : i32
    %c0_i32_1 = arith.constant 0 : i32
    return %c0_i32, %c0_i32_0 : i32, i32
  }
  func.func @transform_3(%arg0: i32) -> (i32, i32) {
    %c0_i32 = arith.constant 0 : i32
    %c0_i32_0 = arith.constant 0 : i32
    %c0_i32_1 = arith.constant 0 : i32
    return %c0_i32, %c0_i32_0 : i32, i32
  }
  func.func @transform_4(%arg0: i32) -> (i32, i32) {
    %c0_i32 = arith.constant 0 : i32
    %c0_i32_0 = arith.constant 0 : i32
    %c0_i32_1 = arith.constant 0 : i32
    return %c0_i32, %c0_i32_0 : i32, i32
  }
  func.func @transform_5(%arg0: i32) -> (i32, i32) {
    %c0_i32 = arith.constant 0 : i32
    %c0_i32_0 = arith.constant 0 : i32
    %c0_i32_1 = arith.constant 0 : i32
    return %c0_i32, %c0_i32_0 : i32, i32
  }
  func.func @transform_6(%arg0: i32) -> (i32, i32) {
    %c0_i32 = arith.constant 0 : i32
    %c0_i32_0 = arith.constant 0 : i32
    return %arg0, %c0_i32 : i32, i32
  }
}

</mosaic_0001>

<bundles_post_ra>
// kernel: tpu_custom_call.1
= control target key start
LH: loop header
LB: loop body
LE: loop exit
PB: predicated region body
PF: predicated region fallthrough
CT: control target
= control target key end

     0   :  { %s1674_s0 = inlined_call_operand.hbm [shape: f32[8,8,8], index: 0, kind: input, shape index: {}]   ;;  %s1675_s1 = inlined_call_operand.hbm [shape: f32[8,128], index: 1, kind: input, shape index: {}]   ;;  %s1676_s2 = inlined_call_operand.hbm [shape: f32[32,128], index: 2, kind: input, shape index: {}]   ;;  %s1677_s3 = inlined_call_operand.vmem [shape: f32[1,128], index: 3, kind: input, shape index: {}]   ;;  %s1678_s4 = inlined_call_operand.vmem [shape: f32[1,32], index: 4, kind: input, shape index: {}]   ;;  %s1679_s5 = inlined_call_operand.<no memory space> [shape: f32[1,1], index: 5, kind: input, shape index: {}]   ;;  %s1680_s6 = inlined_call_operand.vmem [shape: f32[8,1], index: 6, kind: output, shape index: {}]  }
   0x1   :  { %v11_v0 = vstv %s1679_s5 }
   0x2   :  { %12 = vst [vmem:[#allocation3] sm:$0x1] %v11_v0 }
   0x3   :  { %13 = vsyncpa [#allocation5], 0 }
   0x4   :  { %14 = vsyncpa [#allocation7], 0  ;;  %s1450_s23 = smov [#allocation6]   ;;  %s1451_s25 = smov [#allocation4]  }
   0x5   :  { %s33_s24 = sshll.u32 %s1450_s23, 4  ;;  %s20_s26 = sshll.u32 %s1451_s25, 4  ;;  %s34_s24 = int_to_ptr.vmem [resolvable:$true] %s33_s24  ;;  %s1499_s26 = int_to_ptr.vmem [resolvable:$true] %s20_s26 }
   0x6   :  { %s1380_s29 = scalar_lea.hbm %s1675_s1, 128 }
   0x7   :  { %p1381_p0 = scmp.ne.s32.totalorder %s1675_s1, %s1380_s29  ;;  %p1384_p1 = scmp.lt.u32.totalorder %s1380_s29, %s1675_s1 }
   0x9   :  { %p1386_p2 = pnand %p1384_p1, %p1381_p0 }
   0xb   :  { %1389 = shalt.err (!%p1386_p2)
}
   0xc   :  { %s1390_s9 = scalar_lea.vmem %s34_s24, 128  ;;  %p1395_p4 = scmp.lt.s32.totalorder %s34_s24, %s34_s24 }
   0xd   :  { %p1391_p3 = scmp.ne.s32.totalorder %s34_s24, %s1390_s9  ;;  %p1396_p5 = scmp.lt.s32.totalorder %s1390_s9, %s1390_s9 }
   0xf   :  { %p1397_p6 = por %p1396_p5, %p1395_p4 }
  0x11   :  { %p1398_p7 = pnand %p1397_p6, %p1391_p3 }
  0x13   :  { %1401 = shalt.err (!%p1398_p7)
}
  0x14   :  { %36 = dma.hbm_to_vmem [thread:$0]  %s1675_s1, 128, %s34_s24, [#allocation7]  }
  0x15   :  { %s1402_s14 = scalar_lea.hbm %s1674_s0, 1024 }
  0x16   :  { %p1403_p8 = scmp.ne.s32.totalorder %s1674_s0, %s1402_s14  ;;  %p1406_p9 = scmp.lt.u32.totalorder %s1402_s14, %s1674_s0 }
  0x18   :  { %p1408_p10 = pnand %p1406_p9, %p1403_p8 }
  0x1a   :  { %1411 = shalt.err (!%p1408_p10)
}
  0x1b   :  { %s1412_s19 = scalar_lea.vmem %s1499_s26, 1024  ;;  %p1417_p12 = scmp.lt.s32.totalorder %s1499_s26, %s1499_s26 }
  0x1c   :  { %p1413_p11 = scmp.ne.s32.totalorder %s1499_s26, %s1412_s19  ;;  %p1418_p13 = scmp.lt.s32.totalorder %s1412_s19, %s1412_s19 }
  0x1e   :  { %p1419_p0 = por %p1418_p13, %p1417_p12 }
  0x20   :  { %p1420_p1 = pnand %p1419_p0, %p1413_p11 }
  0x22   :  { %1423 = shalt.err (!%p1420_p1)
}
  0x23   :  { %s1452_s1 = smov 128   ;;  %s1453_s20 = smov 8  }
  0x24   :  { %26 = dma.hbm_to_vmem [thread:$0]  %s1674_s0, 1024, %s1499_s26, [#allocation5], %s1452_s1, %s1452_s1, %s1453_s20  }
  0x25   :  { %s1454_s23 = smov [#allocation8]   ;;  %s1424_s28 = scalar_lea.hbm %s1676_s2, 512 }
  0x26   :  { %s42_s24 = sshll.u32 %s1454_s23, 4  ;;  %p1425_p2 = scmp.ne.s32.totalorder %s1676_s2, %s1424_s28  ;;  %s43_s24 = int_to_ptr.vmem [resolvable:$true] %s42_s24 }
  0x27   :  { %p1428_p3 = scmp.lt.u32.totalorder %s1424_s28, %s1676_s2 }
  0x29   :  { %p1430_p4 = pnand %p1428_p3, %p1425_p2 }
  0x2b   :  { %1433 = shalt.err (!%p1430_p4)
}
  0x2c   :  { %s1434_s5 = scalar_lea.vmem %s43_s24, 512  ;;  %p1439_p6 = scmp.lt.s32.totalorder %s43_s24, %s43_s24 }
  0x2d   :  { %p1435_p5 = scmp.ne.s32.totalorder %s43_s24, %s1434_s5  ;;  %p1440_p7 = scmp.lt.s32.totalorder %s1434_s5, %s1434_s5 }
  0x2f   :  { %p1441_p8 = por %p1440_p7, %p1439_p6 }
  0x31   :  { %p1442_p9 = pnand %p1441_p8, %p1435_p5 }
  0x33   :  { %1445 = shalt.err (!%p1442_p9)
}
  0x34   :  { %48 = dma.hbm_to_vmem [thread:$0]  %s1676_s2, 512, %s43_s24, [#allocation7], %s1452_s1, %s1452_s1, %s1453_s20  }
  0x35   :  { %1446 = dma.done.wait [#allocation5], 1024  }
  0x36   :  { %1447 = vsyncadd [#allocation5], 4294966272 }
  0x37   :  { %1448 = dma.done.wait [#allocation7], 640  }
  0x38   :  { %1449 = vsyncadd [#allocation7], 4294966656  ;;  %v1455_v1 = vmov 0.0|0.0   ;;  %vm1456_vm0 = vmmov 0   ;;  %v1457_v2 = vmov 0.0   ;;  %vm80_vm1 = vcmask 64512  }
  0x39   :  { %1253 = vmatprep.subr.bf16.mxu1 %v1455_v1  ;;  %1173 = vmatprep.mubr.msk.f32.mxu1 %vm1456_vm0, %v1457_v2  ;;  %v218_v3 = vld [vmem:[#allocation8] sm:$0xff]  ;;  %v219_v4 = vld [vmem:[#allocation8 + $0x8] sm:$0xff]  ;;  %v72_v5 = vld [vmem:[#allocation6] sm:$0xff]  ;;  %s1458_s10 = smov 64   ;;  %vm223_vm2 = vcmask 261120   ;;  %s1460_s13 = smov 96  }
  0x3a   :  { %v1545_v6 = vpack.c.bf16 %v219_v4, %v218_v3  ;;  %1151 = vmatprep.subr.mxu0 %v72_v5  ;;  %v64_v7 = vld [vmem:[#allocation4] sm:$0xff]  ;;  %v65_v8 = vld [vmem:[#allocation4 + $0x8] sm:$0xff]  ;;  %v220_v9 = vld [vmem:[#allocation8 + $0x10] sm:$0xff]  ;;  %vm1067_vm3 = vcmask 7168  }
  0x3b   :  { %1152 = vmatpush3.msra.mxu0 %v72_v5  ;;  %1153 = vmatprep.mubr.msk.f32.mxu0 %vm80_vm1, %v64_v7  ;;  %v221_v10 = vld [vmem:[#allocation8 + $0x18] sm:$0xff]  ;;  %v1570_v13 = vld [vmem:[%s1677_s3] ss:$0 sm:$0xff]  ;;  %s1459_s3 = smov 32   ;;  %v66_v47 = vld [vmem:[#allocation4 + $0x10] sm:$0xff] }
  0x3c   :  { %1255 = vmatpush3.bf16.msra.mxu1 %v1545_v6  ;;  %1154 = vmatmul.mubr.msk.f32.vlgmr.msra.gmra.mrb[0].mxu0 %vm80_vm1, %v65_v8  ;;  %v1550_v11 = vpack.c.bf16 %v221_v10, %v220_v9  ;;  %v67_v48 = vld [vmem:[#allocation4 + $0x18] sm:$0xff]  ;;  %v68_v49 = vld [vmem:[#allocation4 + $0x20] sm:$0xff]  ;;  %v69_v50 = vld [vmem:[#allocation4 + $0x28] sm:$0xff] }
  0x3d   :  { %1256 = vmatprep.subr.bf16.mxu1 %v1455_v1  ;;  %1265 = vmatprep.subr.bf16.mxu0 %v1455_v1  ;;  %v70_v51 = vld [vmem:[#allocation4 + $0x30] sm:$0xff]  ;;  %v71_v52 = vld [vmem:[#allocation4 + $0x38] sm:$0xff] }
  0x3e   :  { %1267 = vmatpush3.bf16.msra.mxu0 %v1545_v6  ;;  %1156 = vmatprep.mubr.msk.f32.mxu0 %vm80_vm1, %v66_v47 }
  0x3f   :  { %1268 = vmatprep.subr.bf16.mxu0 %v1455_v1 }
  0x40   :  { %1258 = vmatpush3.bf16.msra.mxu1 %v1550_v11  ;;  %1157 = vmatmul.mubr.msk.f32.gmra.mrb[2].mxu0 %vm80_vm1, %v67_v48 }
  0x41   :  { %1259 = vmatprep.subr.bf16.mxu1 %v1455_v1  ;;  %1159 = vmatprep.mubr.msk.f32.mxu0 %vm80_vm1, %v68_v49 }
  0x42   :  { %1270 = vmatpush3.bf16.msra.mxu0 %v1550_v11 }
  0x43   :  { %1174 = vmatmul.mubr.f32.vlgmr.msra.gmra.mrb[0].mxu1 %v1457_v2  ;;  %1277 = vmatprep.subr.bf16.mxu0 %v1455_v1 }
  0x44   :  { %1261 = vmatpush3.bf16.msra.mxu1 %v1545_v6  ;;  %1184 = vmatprep.mubr.msk.f32.mxu1 %vm1456_vm0, %v1457_v2 }
  0x45   :  { %1262 = vmatprep.subr.bf16.mxu1 %v1455_v1  ;;  %1160 = vmatmul.mubr.msk.f32.gmra.mrb[4].mxu0 %vm80_vm1, %v69_v50 }
  0x46   :  { %1162 = vmatprep.mubr.msk.f32.mxu0 %vm80_vm1, %v70_v51 }
  0x48   :  { %1264 = vmatpush3.bf16.msra.mxu1 %v1550_v11 }
  0x49   :  { %1271 = vmatprep.subr.bf16.mxu1 %v1455_v1  ;;  %1163 = vmatmul.mubr.msk.f32.gmra.mrb[6].mxu0 %vm80_vm1, %v71_v52 }
  0x4a   :  { %1195 = vmatprep.mubr.msk.f32.mxu0 %vm1456_vm0, %v1457_v2 }
 0x10f   :  { %v1155_v12 = vpop.f32.mrb[0].mxu0 }
 0x110   :  { %v171_v14 = vpop.f32.mrb[1].mxu0  ;;  %v177_v33 = vadd.f32 %v1155_v12, %v1570_v13 }
 0x111   :  { %v172_v15 = vadd.f32 %v1570_v13, %v171_v14 }
 0x113   :  { %v1158_v56 = vpop.f32.mrb[2].mxu0 }
 0x114   :  { %v181_v57 = vpop.f32.mrb[3].mxu0 }
 0x115   :  { %v182_v63 = vadd.f32 %v1570_v13, %v181_v57 }
 0x116   :  { %v293_v16 = vpop.f32.mrb[0].mxu1 }
 0x117   :  { %v297_v17 = vadd.f32 %v293_v16, %v172_v15  ;;  %v1175_v18 = vpop.f32.mrb[1].mxu1 }
 0x118   :  { %v1597_v58 = vpop.f32.mrb[4].mxu0 }
 0x119   :  { %1312 = vtanh.f32 %v297_v17  ;;  %v1084_v20 = vmul.f32 -1.442695, %v297_v17  ;;  %v1599_v59 = vpop.f32.mrb[5].mxu0 }
 0x11b   :  { %1314 = vpow2.f32 %v1084_v20 }
 0x11c   :  { %v1601_v60 = vpop.f32.mrb[6].mxu0 }
 0x11d   :  { %v1603_v61 = vpop.f32.mrb[7].mxu0 }
 0x123   :  { %v1313_v19 = vpop.eup %1312 }
 0x124   :  { %307 = vrot.lane.b32.xlu0 %v1313_v19, %s1458_s10 }
 0x125   :  { %v1315_v21 = vpop.eup %1314 }
 0x126   :  { %v301_v22 = vadd.f32 1.0, %v1315_v21 }
 0x128   :  { %1316 = vrcp.f32 %v301_v22  ;;  %v187_v22 = vadd.f32 %v1158_v56, %v1570_v13 }
 0x132   :  { %v1317_v23 = vpop.eup %1316 }
 0x133   :  { %v305_v26 = vmul.f32 0.0, %v1317_v23 }
 0x196   :  { %v308_v24 = vpop.permute.xlu0 %307 }
 0x197   :  { %v310_v25 = vmul.f32 %v1317_v23, %v308_v24 }
 0x199   :  { %312 = vrot.lane.b32.xlu0 %v310_v25, %s1459_s3 }
 0x20b   :  { %v313_v27 = vpop.permute.xlu0 %312 }
 0x20c   :  { %v315_v28 = vadd.f32 %v313_v27, %v305_v26 }
 0x20e   :  { %1318 = vtanh.f32 %v315_v28 }
 0x218   :  { %v1319_v29 = vpop.eup %1318 }
 0x219   :  { %318 = vrot.lane.b32.xlu1 %v1319_v29, %s1458_s10 }
 0x28b   :  { %v319_v30 = vpop.permute.xlu1 %318 }
 0x28c   :  { %v321_v31 = vmul.f32 %v1317_v23, %v319_v30 }
 0x28e   :  { %325 = vrot.lane.b32.xlu1 %v321_v31, %s1459_s3 }
 0x300   :  { %v326_v32 = vpop.permute.xlu1 %325 }
 0x301   :  { %1185 = vmatmul.mubr.msk.f32.vlgmr.msra.gmra.mrb[2].mxu1 %vm223_vm2, %v326_v32 }
 0x302   :  { %1273 = vmatpush3.bf16.msra.mxu1 %v1545_v6  ;;  %1206 = vmatprep.mubr.msk.f32.mxu1 %vm1456_vm0, %v1457_v2 }
 0x303   :  { %1274 = vmatprep.subr.bf16.mxu1 %v1455_v1 }
 0x306   :  { %1276 = vmatpush3.bf16.msra.mxu1 %v1550_v11 }
 0x307   :  { %1283 = vmatprep.subr.bf16.mxu1 %v1455_v1 }
 0x3d4   :  { %v395_v34 = vpop.f32.mrb[2].mxu1 }
 0x3d5   :  { %v399_v35 = vadd.f32 %v395_v34, %v177_v33  ;;  %v1186_v36 = vpop.f32.mrb[3].mxu1 }
 0x3d7   :  { %1320 = vtanh.f32 %v399_v35  ;;  %v1086_v38 = vmul.f32 -1.442695, %v399_v35 }
 0x3d9   :  { %1322 = vpow2.f32 %v1086_v38 }
 0x3e1   :  { %v1321_v37 = vpop.eup %1320 }
 0x3e2   :  { %409 = vrot.lane.b32.xlu0 %v1321_v37, %s1458_s10 }
 0x3e3   :  { %v1323_v39 = vpop.eup %1322 }
 0x3e4   :  { %v403_v40 = vadd.f32 1.0, %v1323_v39 }
 0x3e6   :  { %1324 = vrcp.f32 %v403_v40  ;;  %v192_v40 = vadd.f32 %v1570_v13, %v1599_v59  ;;  %v197_v59 = vadd.f32 %v1597_v58, %v1570_v13 }
 0x3f0   :  { %v1325_v41 = vpop.eup %1324 }
 0x3f1   :  { %v407_v44 = vmul.f32 %v1325_v41, %v315_v28 }
 0x454   :  { %v410_v42 = vpop.permute.xlu0 %409 }
 0x455   :  { %v412_v43 = vmul.f32 %v1325_v41, %v410_v42 }
 0x457   :  { %414 = vrot.lane.b32.xlu1 %v412_v43, %s1459_s3 }
 0x4c9   :  { %v415_v45 = vpop.permute.xlu1 %414 }
 0x4ca   :  { %v417_v46 = vadd.f32 %v415_v45, %v407_v44 }
 0x4cc   :  { %1326 = vtanh.f32 %v417_v46 }
 0x4d6   :  { %v1327_v53 = vpop.eup %1326 }
 0x4d7   :  { %420 = vrot.lane.b32.xlu0 %v1327_v53, %s1458_s10 }
 0x549   :  { %v421_v54 = vpop.permute.xlu0 %420 }
 0x54a   :  { %v423_v55 = vmul.f32 %v1325_v41, %v421_v54 }
 0x54c   :  { %427 = vrot.lane.b32.xlu1 %v423_v55, %s1459_s3 }
 0x5be   :  { %v428_v62 = vpop.permute.xlu1 %427 }
 0x5bf   :  { %1196 = vmatmul.mubr.msk.f32.vlgmr.msra.gmra.mrb[8].mxu0 %vm223_vm2, %v428_v62 }
 0x5c0   :  { %1279 = vmatpush3.bf16.msra.mxu0 %v1545_v6  ;;  %1217 = vmatprep.mubr.msk.f32.mxu0 %vm1456_vm0, %v1457_v2 }
 0x5c1   :  { %1280 = vmatprep.subr.bf16.mxu0 %v1455_v1 }
 0x5c4   :  { %1282 = vmatpush3.bf16.msra.mxu0 %v1550_v11 }
 0x5c5   :  { %1289 = vmatprep.subr.bf16.mxu0 %v1455_v1 }
 0x692   :  { %v497_v0 = vpop.f32.mrb[8].mxu0 }
 0x693   :  { %v501_v3 = vadd.f32 %v497_v0, %v182_v63  ;;  %v1197_v4 = vpop.f32.mrb[9].mxu0 }
 0x695   :  { %1328 = vtanh.f32 %v501_v3  ;;  %v1088_v7 = vmul.f32 -1.442695, %v501_v3 }
 0x697   :  { %1330 = vpow2.f32 %v1088_v7 }
 0x69f   :  { %v1329_v5 = vpop.eup %1328 }
 0x6a0   :  { %511 = vrot.lane.b32.xlu0 %v1329_v5, %s1458_s10 }
 0x6a1   :  { %v1331_v8 = vpop.eup %1330 }
 0x6a2   :  { %v505_v9 = vadd.f32 1.0, %v1331_v8 }
 0x6a4   :  { %1332 = vrcp.f32 %v505_v9 }
 0x6ae   :  { %v1333_v10 = vpop.eup %1332 }
 0x6af   :  { %v509_v15 = vmul.f32 %v1333_v10, %v417_v46 }
 0x712   :  { %v512_v12 = vpop.permute.xlu0 %511 }
 0x713   :  { %v514_v14 = vmul.f32 %v1333_v10, %v512_v12 }
 0x715   :  { %516 = vrot.lane.b32.xlu1 %v514_v14, %s1459_s3 }
 0x787   :  { %v517_v16 = vpop.permute.xlu1 %516 }
 0x788   :  { %v519_v17 = vadd.f32 %v517_v16, %v509_v15  ;;  %v202_v15 = vadd.f32 %v1570_v13, %v1603_v61 }
 0x78a   :  { %1334 = vtanh.f32 %v519_v17 }
 0x794   :  { %v1335_v18 = vpop.eup %1334 }
 0x795   :  { %522 = vrot.lane.b32.xlu0 %v1335_v18, %s1458_s10 }
 0x807   :  { %v523_v19 = vpop.permute.xlu0 %522 }
 0x808   :  { %v525_v20 = vmul.f32 %v1333_v10, %v523_v19 }
 0x80a   :  { %529 = vrot.lane.b32.xlu1 %v525_v20, %s1459_s3 }
 0x87c   :  { %v530_v21 = vpop.permute.xlu1 %529 }
 0x87d   :  { %1207 = vmatmul.mubr.msk.f32.vlgmr.msra.gmra.mrb[4].mxu1 %vm223_vm2, %v530_v21 }
 0x87e   :  { %1285 = vmatpush3.bf16.msra.mxu1 %v1545_v6  ;;  %1228 = vmatprep.mubr.msk.f32.mxu1 %vm1456_vm0, %v1457_v2 }
 0x87f   :  { %1286 = vmatprep.subr.bf16.mxu1 %v1455_v1 }
 0x882   :  { %1288 = vmatpush3.bf16.msra.mxu1 %v1550_v11 }
 0x883   :  { %1295 = vmatprep.subr.bf16.mxu1 %v1455_v1 }
 0x950   :  { %v599_v23 = vpop.f32.mrb[4].mxu1 }
 0x951   :  { %v603_v24 = vadd.f32 %v599_v23, %v187_v22  ;;  %v1208_v25 = vpop.f32.mrb[5].mxu1 }
 0x953   :  { %1336 = vtanh.f32 %v603_v24  ;;  %v1090_v27 = vmul.f32 -1.442695, %v603_v24 }
 0x955   :  { %1338 = vpow2.f32 %v1090_v27 }
 0x95d   :  { %v1337_v26 = vpop.eup %1336 }
 0x95e   :  { %613 = vrot.lane.b32.xlu0 %v1337_v26, %s1458_s10 }
 0x95f   :  { %v1339_v28 = vpop.eup %1338 }
 0x960   :  { %v607_v29 = vadd.f32 1.0, %v1339_v28 }
 0x962   :  { %1340 = vrcp.f32 %v607_v29 }
 0x96c   :  { %v1341_v30 = vpop.eup %1340 }
 0x96d   :  { %v611_v33 = vmul.f32 %v1341_v30, %v519_v17 }
 0x9d0   :  { %v614_v31 = vpop.permute.xlu0 %613 }
 0x9d1   :  { %v616_v32 = vmul.f32 %v1341_v30, %v614_v31 }
 0x9d3   :  { %618 = vrot.lane.b32.xlu1 %v616_v32, %s1459_s3  ;;  %v207_v32 = vadd.f32 %v1601_v60, %v1570_v13  ;;  %v1099_v13 = vld [vmem:[%s1678_s4] ss:$0 sm:$0xff] }
 0xa45   :  { %v619_v34 = vpop.permute.xlu1 %618 }
 0xa46   :  { %v621_v35 = vadd.f32 %v619_v34, %v611_v33 }
 0xa48   :  { %1342 = vtanh.f32 %v621_v35 }
 0xa52   :  { %v1343_v36 = vpop.eup %1342 }
 0xa53   :  { %624 = vrot.lane.b32.xlu0 %v1343_v36, %s1458_s10 }
 0xac5   :  { %v625_v37 = vpop.permute.xlu0 %624 }
 0xac6   :  { %v627_v38 = vmul.f32 %v1341_v30, %v625_v37 }
 0xac8   :  { %631 = vrot.lane.b32.xlu1 %v627_v38, %s1459_s3 }
 0xb3a   :  { %v632_v39 = vpop.permute.xlu1 %631 }
 0xb3b   :  { %1218 = vmatmul.mubr.msk.f32.vlgmr.msra.gmra.mrb[10].mxu0 %vm223_vm2, %v632_v39 }
 0xb3c   :  { %1291 = vmatpush3.bf16.msra.mxu0 %v1545_v6  ;;  %1239 = vmatprep.mubr.msk.f32.mxu0 %vm1456_vm0, %v1457_v2 }
 0xb3d   :  { %1292 = vmatprep.subr.bf16.mxu0 %v1455_v1 }
 0xb40   :  { %1294 = vmatpush3.bf16.msra.mxu0 %v1550_v11 }
 0xc0e   :  { %v701_v41 = vpop.f32.mrb[10].mxu0 }
 0xc0f   :  { %v705_v42 = vadd.f32 %v701_v41, %v192_v40  ;;  %v1219_v43 = vpop.f32.mrb[11].mxu0 }
 0xc11   :  { %1344 = vtanh.f32 %v705_v42  ;;  %v1092_v45 = vmul.f32 -1.442695, %v705_v42 }
 0xc13   :  { %1346 = vpow2.f32 %v1092_v45 }
 0xc1b   :  { %v1345_v44 = vpop.eup %1344 }
 0xc1c   :  { %715 = vrot.lane.b32.xlu0 %v1345_v44, %s1458_s10 }
 0xc1d   :  { %v1347_v46 = vpop.eup %1346 }
 0xc1e   :  { %v709_v47 = vadd.f32 1.0, %v1347_v46 }
 0xc20   :  { %1348 = vrcp.f32 %v709_v47 }
 0xc2a   :  { %v1349_v48 = vpop.eup %1348 }
 0xc2b   :  { %v713_v51 = vmul.f32 %v1349_v48, %v621_v35 }
 0xc8e   :  { %v716_v49 = vpop.permute.xlu0 %715 }
 0xc8f   :  { %v718_v50 = vmul.f32 %v1349_v48, %v716_v49 }
 0xc91   :  { %720 = vrot.lane.b32.xlu1 %v718_v50, %s1459_s3 }
 0xd03   :  { %v721_v52 = vpop.permute.xlu1 %720 }
 0xd04   :  { %v723_v53 = vadd.f32 %v721_v52, %v713_v51  ;;  %v1100_v52 = vld [vmem:[#allocation3] ss:$0 sm:$0xff] }
 0xd06   :  { %1350 = vtanh.f32 %v723_v53 }
 0xd10   :  { %v1351_v54 = vpop.eup %1350 }
 0xd11   :  { %726 = vrot.lane.b32.xlu0 %v1351_v54, %s1458_s10 }
 0xd83   :  { %v727_v55 = vpop.permute.xlu0 %726 }
 0xd84   :  { %v729_v56 = vmul.f32 %v1349_v48, %v727_v55 }
 0xd86   :  { %733 = vrot.lane.b32.xlu1 %v729_v56, %s1459_s3 }
 0xdf8   :  { %v734_v57 = vpop.permute.xlu1 %733 }
 0xdf9   :  { %1229 = vmatmul.mubr.msk.f32.vlgmr.msra.gmra.mrb[6].mxu1 %vm223_vm2, %v734_v57 }
 0xdfa   :  { %1297 = vmatpush3.bf16.msra.mxu1 %v1545_v6  ;;  %1250 = vmatprep.mubr.msk.f32.mxu1 %vm1456_vm0, %v1457_v2 }
 0xdfb   :  { %1298 = vmatprep.subr.bf16.mxu1 %v1455_v1 }
 0xdfe   :  { %1300 = vmatpush3.bf16.msra.mxu1 %v1550_v11 }
 0xecc   :  { %v803_v62 = vpop.f32.mrb[6].mxu1 }
 0xecd   :  { %v807_v63 = vadd.f32 %v803_v62, %v197_v59  ;;  %v1230_v0 = vpop.f32.mrb[7].mxu1 }
 0xecf   :  { %1352 = vtanh.f32 %v807_v63  ;;  %v1094_v4 = vmul.f32 -1.442695, %v807_v63 }
 0xed1   :  { %1354 = vpow2.f32 %v1094_v4 }
 0xed9   :  { %v1353_v3 = vpop.eup %1352 }
 0xeda   :  { %817 = vrot.lane.b32.xlu0 %v1353_v3, %s1458_s10 }
 0xedb   :  { %v1355_v6 = vpop.eup %1354 }
 0xedc   :  { %v811_v5 = vadd.f32 1.0, %v1355_v6 }
 0xede   :  { %1356 = vrcp.f32 %v811_v5 }
 0xee8   :  { %v1357_v2 = vpop.eup %1356 }
 0xee9   :  { %v815_v11 = vmul.f32 %v1357_v2, %v723_v53 }
 0xf4c   :  { %v818_v7 = vpop.permute.xlu0 %817 }
 0xf4d   :  { %v820_v1 = vmul.f32 %v1357_v2, %v818_v7 }
 0xf4f   :  { %822 = vrot.lane.b32.xlu1 %v820_v1, %s1459_s3 }
 0xfc1   :  { %v823_v8 = vpop.permute.xlu1 %822 }
 0xfc2   :  { %v825_v58 = vadd.f32 %v823_v8, %v815_v11 }
 0xfc4   :  { %1358 = vtanh.f32 %v825_v58 }
 0xfce   :  { %v1359_v9 = vpop.eup %1358 }
 0xfcf   :  { %828 = vrot.lane.b32.xlu0 %v1359_v9, %s1458_s10 }
0x1041   :  { %v829_v10 = vpop.permute.xlu0 %828 }
0x1042   :  { %v831_v12 = vmul.f32 %v1357_v2, %v829_v10 }
0x1044   :  { %835 = vrot.lane.b32.xlu1 %v831_v12, %s1459_s3 }
0x10b6   :  { %v836_v14 = vpop.permute.xlu1 %835 }
0x10b7   :  { %1240 = vmatmul.mubr.msk.f32.vlgmr.msra.gmra.mrb[12].mxu0 %vm223_vm2, %v836_v14 }
0x118a   :  { %v905_v16 = vpop.f32.mrb[12].mxu0 }
0x118b   :  { %v909_v17 = vadd.f32 %v905_v16, %v202_v15  ;;  %v1241_v18 = vpop.f32.mrb[13].mxu0 }
0x118d   :  { %1360 = vtanh.f32 %v909_v17  ;;  %v1096_v20 = vmul.f32 -1.442695, %v909_v17 }
0x118f   :  { %1362 = vpow2.f32 %v1096_v20 }
0x1197   :  { %v1361_v19 = vpop.eup %1360 }
0x1198   :  { %919 = vrot.lane.b32.xlu0 %v1361_v19, %s1458_s10 }
0x1199   :  { %v1363_v21 = vpop.eup %1362 }
0x119a   :  { %v913_v22 = vadd.f32 1.0, %v1363_v21 }
0x119c   :  { %1364 = vrcp.f32 %v913_v22 }
0x11a6   :  { %v1365_v23 = vpop.eup %1364 }
0x11a7   :  { %v917_v26 = vmul.f32 %v1365_v23, %v825_v58 }
0x120a   :  { %v920_v24 = vpop.permute.xlu0 %919 }
0x120b   :  { %v922_v25 = vmul.f32 %v1365_v23, %v920_v24 }
0x120d   :  { %924 = vrot.lane.b32.xlu1 %v922_v25, %s1459_s3 }
0x127f   :  { %v925_v27 = vpop.permute.xlu1 %924 }
0x1280   :  { %v927_v61 = vadd.f32 %v925_v27, %v917_v26 }
0x1282   :  { %1366 = vtanh.f32 %v927_v61 }
0x128c   :  { %v1367_v28 = vpop.eup %1366 }
0x128d   :  { %930 = vrot.lane.b32.xlu0 %v1367_v28, %s1458_s10 }
0x12ff   :  { %v931_v29 = vpop.permute.xlu0 %930 }
0x1300   :  { %v933_v30 = vmul.f32 %v1365_v23, %v931_v29 }
0x1302   :  { %937 = vrot.lane.b32.xlu1 %v933_v30, %s1459_s3 }
0x1374   :  { %v938_v31 = vpop.permute.xlu1 %937 }
0x1375   :  { %1251 = vmatmul.mubr.msk.f32.vlgmr.msra.gmra.mrb[8].mxu1 %vm223_vm2, %v938_v31 }
0x1448   :  { %v1007_v33 = vpop.f32.mrb[8].mxu1 }
0x1449   :  { %v1011_v34 = vadd.f32 %v1007_v33, %v207_v32  ;;  %v1252_v35 = vpop.f32.mrb[9].mxu1 }
0x144b   :  { %1368 = vtanh.f32 %v1011_v34  ;;  %v1098_v37 = vmul.f32 -1.442695, %v1011_v34 }
0x144d   :  { %1370 = vpow2.f32 %v1098_v37 }
0x1455   :  { %v1369_v36 = vpop.eup %1368 }
0x1456   :  { %1021 = vrot.lane.b32.xlu0 %v1369_v36, %s1458_s10 }
0x1457   :  { %v1371_v38 = vpop.eup %1370 }
0x1458   :  { %v1015_v39 = vadd.f32 1.0, %v1371_v38 }
0x145a   :  { %1372 = vrcp.f32 %v1015_v39 }
0x1464   :  { %v1373_v40 = vpop.eup %1372 }
0x1465   :  { %v1019_v60 = vmul.f32 %v1373_v40, %v927_v61 }
0x14c8   :  { %v1022_v41 = vpop.permute.xlu0 %1021 }
0x14c9   :  { %v1024_v42 = vmul.f32 %v1373_v40, %v1022_v41 }
0x14cb   :  { %1026 = vrot.lane.b32.xlu1 %v1024_v42, %s1459_s3 }
0x14cf   :  { %1042 = vrot.lane.b32.xlu1 %v1099_v13, %s1460_s13 }
0x153d   :  { %v1027_v43 = vpop.permute.xlu1 %1026 }
0x153e   :  { %v1029_v44 = vadd.f32 %v1027_v43, %v1019_v60 }
0x1540   :  { %1374 = vtanh.f32 %v1029_v44 }
0x1541   :  { %v1043_v47 = vpop.permute.xlu1 %1042 }
0x154a   :  { %v1375_v45 = vpop.eup %1374 }
0x154b   :  { %1032 = vrot.lane.b32.xlu0 %v1375_v45, %s1458_s10 }
0x15bd   :  { %v1033_v46 = vpop.permute.xlu0 %1032 }
0x15be   :  { %v1035_v48 = vmul.f32 %v1373_v40, %v1033_v46 }
0x15c0   :  { %v1045_v49 = vmul.f32 %v1043_v47, %v1035_v48 }
0x15c2   :  { %1047 = vrot.lane.b32.xlu0 %v1045_v49, %s1459_s3 }
0x1634   :  { %v1048_v50 = vpop.permute.xlu0 %1047 }
0x1635   :  { %v1050_v51 = vsel %vm223_vm2, %v1048_v50, 0.0 }
0x1636   :  { %1051 = vadd.xlane.f32.xlu1 %v1050_v51 }
0x16c3   :  { %v1052_v53 = vpop.xlane.xlu1 %1051 }
0x16c4   :  { %v1060_v54 = vadd.f32 %v1100_v52, %v1052_v53 }
0x16c6   :  { %v1101_v55 = vmul.f32 -1.442695, %v1060_v54 }
0x16c8   :  { %1376 = vpow2.f32 %v1101_v55 }
0x16d2   :  { %v1377_v56 = vpop.eup %1376 }
0x16d3   :  { %v1064_v57 = vadd.f32 1.0, %v1377_v56 }
0x16d5   :  { %1378 = vrcp.f32 %v1064_v57 }
0x16df   :  { %v1379_v59 = vpop.eup %1378 }
0x16e0   :  { %1068 = vst.msk [vmem:[%s1680_s6] sm:$0xff] %vm1067_vm3, %v1379_v59 }
0x16e1   :  { %1073 = vsyncpa [#allocation5], 1 }
0x16e2   :  { %1074 = vsyncpa [#allocation7], 1 }

</bundles_post_ra>
